<compile_context>
chip_gen: v7x
topology: tpu7x:2x2x1
jax: 0.10.0
libtpu: 0.0.40
codegen_flags: <defaults>
</compile_context>

<pallas_src>
import functools

import jax
import jax.numpy as jnp
import numpy as np
from jax import lax
from jax.experimental import pallas as pl
from jax.experimental.pallas import tpu as pltpu


# ----------------------------- Pallas kernel -------------------------------- #

def cru_kernel(up_ref, low_ref, masks_ref, wsq1_ref, wsq2_ref, wgwc_ref,
               bgwc_ref, wpwc1_ref, wpwc2_ref, o_ref, *, W, b_tile):
    C = wgwc_ref.shape[0]
    low_sq = wsq2_ref.shape[0]
    hi = C - low_sq                     # rows of PWC2 inside y2

    masks = masks_ref[...]              # (4, HW) f32, precomputed in wrapper
    mask_l = masks[0:1, :]              # col != 0
    mask_r = masks[1:2, :]              # col != W-1
    mask_t = masks[2:3, :]              # row != 0
    mask_b = masks[3:4, :]              # row != H-1

    for b in range(b_tile):             # small static unroll over batch tile
        up = up_ref[b]                  # (up_ch, HW)  bf16
        low = low_ref[b]                # (low_ch, HW) bf16

        # squeeze1 / squeeze2 (1x1 conv, no bias): bf16 MXU, f32 accumulation.
        up_s = jnp.dot(wsq1_ref[...], up,
                       preferred_element_type=jnp.float32)      # (up_sq_pad, HW)
        low_s = jnp.dot(wsq2_ref[...], low,
                        preferred_element_type=jnp.float32)     # (low_sq, HW)

        hw = up_s.shape[1]

        # --- GWC: 3x3 grouped conv (padding=1) as one im2col matmul ----------
        # ky bands via lane rolls (+W / -W expressed as positive shifts) with
        # row masks; kx neighbours via +/-1 rolls with column masks.
        band_t = pltpu.roll(up_s, W, axis=1) * mask_t            # row above
        band_b = pltpu.roll(up_s, hw - W, axis=1) * mask_b       # row below
        taps = []
        for band in (band_t, up_s, band_b):                      # ky = 0, 1, 2
            taps.append(pltpu.roll(band, 1, axis=1) * mask_l)    # kx = 0
            taps.append(band)                                    # kx = 1
            taps.append(pltpu.roll(band, hw - 1, axis=1) * mask_r)  # kx = 2
        # tap blocks are round_up(up_sq, 8) rows -> sublane-aligned concat.
        im2col = jnp.concatenate(taps, axis=0).astype(jnp.bfloat16)  # (9*pad, HW)

        gwc = jnp.dot(wgwc_ref[...], im2col,
                      preferred_element_type=jnp.float32) + bgwc_ref[...]  # (C, HW)

        # PWC1 / PWC2 (1x1, no bias)
        pwc1 = jnp.dot(wpwc1_ref[...], up_s.astype(jnp.bfloat16),
                       preferred_element_type=jnp.float32)       # (C, HW)
        y1 = gwc + pwc1
        pwc2 = jnp.dot(wpwc2_ref[...], low_s.astype(jnp.bfloat16),
                       preferred_element_type=jnp.float32)       # (hi, HW)

        # AdaptiveAvgPool2d(1) + softmax over the virtual 2C channels, without
        # materializing concat([y1, y2]).  y2 = [pwc2 ; low_s].
        pooled = jnp.concatenate(
            [jnp.mean(y1, axis=1, keepdims=True),
             jnp.mean(pwc2, axis=1, keepdims=True),
             jnp.mean(low_s, axis=1, keepdims=True)], axis=0)    # (2C, 1)
        m = jnp.max(pooled, axis=0, keepdims=True)
        e = jnp.exp(pooled - m)
        sm = e * pl.reciprocal(jnp.sum(e, axis=0, keepdims=True), approx=True)

        # out1 + out2, written as ONE full-sublane, lane-dense store.
        y2s = jnp.concatenate([pwc2 * sm[C:C + hi],
                               low_s * sm[C + hi:]], axis=0)     # (C, HW)
        o_ref[b] = (y1 * sm[:C] + y2s).astype(o_ref.dtype)


# ------------------------------- wrapper ------------------------------------ #

def _round_up(x, m):
    return (x + m - 1) // m * m


def _pick_b_tile(n, max_tile=4):
    # Amortize per-grid-step overhead but keep >= 2 grid steps (v7x megacore).
    upper = min(max_tile, max(1, n // 2))
    for t in range(upper, 0, -1):
        if n % t == 0:
            return t
    return 1


def cru_forward(x_nchw, kparams, dims):
    wsq1, wsq2, wgwc, bgwc, wpwc1, wpwc2 = kparams
    N, C, H, W = x_nchw.shape
    up_ch = dims["up_ch"]
    HW = H * W

    # Channel split + spatial flatten + bf16 cast hoisted into the wrapper.
    up = x_nchw[:, :up_ch].reshape(N, up_ch, HW).astype(jnp.bfloat16)
    low = x_nchw[:, up_ch:].reshape(N, C - up_ch, HW).astype(jnp.bfloat16)

    # Precomputed edge masks: [col!=0, col!=W-1, row!=0, row!=H-1].
    cols = np.arange(HW, dtype=np.int32) % W
    rows = np.arange(HW, dtype=np.int32) // W
    masks = jnp.asarray(np.stack([cols != 0, cols != W - 1,
                                  rows != 0, rows != H - 1]).astype(np.float32))

    b_tile = _pick_b_tile(N)
    kernel = functools.partial(cru_kernel, W=W, b_tile=b_tile)

    def full_spec(shape):
        nd = len(shape)
        return pl.BlockSpec(shape, lambda n, _nd=nd: (0,) * _nd)

    out = pl.pallas_call(
        kernel,
        out_shape=jax.ShapeDtypeStruct((N, C, HW), jnp.float32),
        grid=(N // b_tile,),
        in_specs=[
            pl.BlockSpec((b_tile, up_ch, HW), lambda n: (n, 0, 0)),
            pl.BlockSpec((b_tile, C - up_ch, HW), lambda n: (n, 0, 0)),
            full_spec(masks.shape),
            full_spec(wsq1.shape),
            full_spec(wsq2.shape),
            full_spec(wgwc.shape),
            full_spec(bgwc.shape),
            full_spec(wpwc1.shape),
            full_spec(wpwc2.shape),
        ],
        out_specs=pl.BlockSpec((b_tile, C, HW), lambda n: (n, 0, 0)),
        compiler_params=pltpu.CompilerParams(
            dimension_semantics=("parallel",),
            # Fits v5e/v6e (128 MiB) and leaves double-buffer headroom under
            # v7x's 64 MiB physical VMEM.
            vmem_limit_bytes=32 * 1024 * 1024),
    )(up, low, masks, wsq1, wsq2, wgwc, bgwc, wpwc1, wpwc2)

    return out.reshape(N, C, H, W)          # flattened NCHW -> NCHW (free)


# --------------------- parameters (deterministic init) ---------------------- #

def make_params(key, op_channel, alpha=0.5, squeeze_radio=2, group_size=2, gk=3):
    C = op_channel
    up_ch = int(alpha * op_channel)
    low_ch = op_channel - up_ch
    up_sq = up_ch // squeeze_radio
    low_sq = low_ch // squeeze_radio
    ks = jax.random.split(key, 6)
    # PyTorch-layout weights (OIHW for convs, 1x1 kernels stored as (O, I)).
    p = dict(
        w_sq1=jax.random.normal(ks[0], (up_sq, up_ch), jnp.float32) * 0.1,
        w_sq2=jax.random.normal(ks[1], (low_sq, low_ch), jnp.float32) * 0.1,
        w_gwc=jax.random.normal(ks[2], (C, up_sq // group_size, gk, gk), jnp.float32) * 0.1,
        b_gwc=jax.random.normal(ks[3], (C,), jnp.float32) * 0.1,
        w_pwc1=jax.random.normal(ks[4], (C, up_sq), jnp.float32) * 0.1,
        w_pwc2=jax.random.normal(ks[5], (C - low_sq, low_sq), jnp.float32) * 0.1,
    )
    dims = dict(up_ch=up_ch, low_ch=low_ch, up_sq=up_sq, low_sq=low_sq,
                group_size=group_size, gk=gk, C=C)
    return p, dims


def to_kernel_params(p, dims):
    C, up_sq, low_sq = dims["C"], dims["up_sq"], dims["low_sq"]
    up_ch = dims["up_ch"]
    gk, groups = dims["gk"], dims["group_size"]
    assert gk == 3, "kernel's roll-based im2col assumes a 3x3 grouped conv"
    in_pg = up_sq // groups
    out_pg = C // groups
    up_sq_pad = _round_up(up_sq, 8)     # sublane-align im2col tap blocks

    # squeeze1: zero-pad output rows so up_s has up_sq_pad rows in-kernel.
    w_sq1 = np.zeros((up_sq_pad, up_ch), np.float32)
    w_sq1[:up_sq] = np.asarray(p["w_sq1"], np.float32)

    # PWC1: matching zero-padded K columns.
    w_pwc1 = np.zeros((C, up_sq_pad), np.float32)
    w_pwc1[:, :up_sq] = np.asarray(p["w_pwc1"], np.float32)

    # GWC: grouped 3x3 fused into one (C, 9*up_sq_pad) im2col weight (zeros
    # outside each output channel's group and in the padded rows).
    wg = np.asarray(p["w_gwc"], np.float32)
    w_fused = np.zeros((C, gk * gk * up_sq_pad), np.float32)
    for c in range(C):
        g = c // out_pg
        for ky in range(gk):
            for kx in range(gk):
                t = ky * gk + kx
                base = t * up_sq_pad + g * in_pg
                w_fused[c, base: base + in_pg] = wg[c, :, ky, kx]

    bf = jnp.bfloat16
    return (
        jnp.asarray(w_sq1, bf),                               # (up_sq_pad, up_ch)
        jnp.asarray(p["w_sq2"], bf),                          # (low_sq, low_ch)
        jnp.asarray(w_fused, bf),                             # (C, 9*up_sq_pad)
        jnp.asarray(p["b_gwc"], jnp.float32).reshape(C, 1),   # (C, 1)  f32
        jnp.asarray(w_pwc1, bf),                              # (C, up_sq_pad)
        jnp.asarray(p["w_pwc2"], bf),                         # (C - low_sq, low_sq)
    )


# ------------------------ pure-JAX reference (NCHW) -------------------------- #

def cru_ref_nchw(x, p, dims):
    up_ch, groups = dims["up_ch"], dims["group_size"]
    conv1 = lambda inp, w: lax.conv_general_dilated(inp, w[:, :, None, None],
                                                    (1, 1), "VALID")
    up, low = x[:, :up_ch], x[:, up_ch:]
    up_s = conv1(up, p["w_sq1"])
    low_s = conv1(low, p["w_sq2"])
    gwc = lax.conv_general_dilated(up_s, p["w_gwc"], (1, 1), ((1, 1), (1, 1)),
                                   feature_group_count=groups)
    gwc = gwc + p["b_gwc"][None, :, None, None]
    y1 = gwc + conv1(up_s, p["w_pwc1"])
    y2 = jnp.concatenate([conv1(low_s, p["w_pwc2"]), low_s], axis=1)
    out = jnp.concatenate([y1, y2], axis=1)
    pooled = jnp.mean(out, axis=(2, 3), keepdims=True)
    out = out * jax.nn.softmax(pooled, axis=1)
    half = out.shape[1] // 2
    return out[:, :half] + out[:, half:]


# ----------------------------------- main ------------------------------------ #

if __name__ == "__main__":
    key = jax.random.PRNGKey(0)
    kx, kp = jax.random.split(key)

    N, C, H, W = 2, 8, 16, 16
    x_nchw = jax.random.normal(kx, (N, C, H, W), jnp.float32)

    params, dims = make_params(kp, C)
    kparams = to_kernel_params(params, dims)

    out = jax.block_until_ready(cru_forward(x_nchw, kparams, dims))

    ref = cru_ref_nchw(x_nchw, params, dims)
    # bf16 MXU operands + approx EUP reciprocal => loosened vs the f32 1e-4 check
    # (expected per review; not a correctness bug).
    np.testing.assert_allclose(np.asarray(out), np.asarray(ref),
                               rtol=2e-2, atol=5e-3)
    print("KERNEL_OK")
</pallas_src>

<mosaic_0001>
module attributes {stable_mosaic.version = 11 : i64} {
  func.func @cru_kernel(%arg0: i32, %arg1: memref<1x4x256xbf16, #tpu.memory_space<vmem>>, %arg2: memref<1x4x256xbf16, #tpu.memory_space<vmem>>, %arg3: memref<4x256xf32, #tpu.memory_space<vmem>>, %arg4: memref<8x4xbf16, #tpu.memory_space<vmem>>, %arg5: memref<2x4xbf16, #tpu.memory_space<vmem>>, %arg6: memref<8x72xbf16, #tpu.memory_space<vmem>>, %arg7: memref<8x1xf32, #tpu.memory_space<vmem>>, %arg8: memref<8x8xbf16, #tpu.memory_space<vmem>>, %arg9: memref<6x2xbf16, #tpu.memory_space<vmem>>, %arg10: memref<1x8x256xf32, #tpu.memory_space<vmem>>) attributes {dimension_semantics = [#tpu.dimension_semantics<parallel>], iteration_bounds = array<i64: 2>, scalar_prefetch = 0 : i64, scratch_operands = 0 : i64, tpu.core_type = #tpu.core_type<tc>, window_params = [{transform_indices = @transform_0, window_bounds = array<i64: 1, 4, 256>}, {transform_indices = @transform_1, window_bounds = array<i64: 1, 4, 256>}, {pipeline_mode = #tpu.pipeline_mode<synchronous>, transform_indices = @transform_2, window_bounds = array<i64: 4, 256>}, {pipeline_mode = #tpu.pipeline_mode<synchronous>, transform_indices = @transform_3, window_bounds = array<i64: 8, 4>}, {pipeline_mode = #tpu.pipeline_mode<synchronous>, transform_indices = @transform_4, window_bounds = array<i64: 2, 4>}, {pipeline_mode = #tpu.pipeline_mode<synchronous>, transform_indices = @transform_5, window_bounds = array<i64: 8, 72>}, {pipeline_mode = #tpu.pipeline_mode<synchronous>, transform_indices = @transform_6, window_bounds = array<i64: 8, 1>}, {pipeline_mode = #tpu.pipeline_mode<synchronous>, transform_indices = @transform_7, window_bounds = array<i64: 8, 8>}, {pipeline_mode = #tpu.pipeline_mode<synchronous>, transform_indices = @transform_8, window_bounds = array<i64: 6, 2>}, {transform_indices = @transform_9, window_bounds = array<i64: 1, 8, 256>}]} {
    %c0 = arith.constant 0 : index
    %c0_0 = arith.constant 0 : index
    %0 = vector.load %arg3[%c0, %c0_0] : memref<4x256xf32, #tpu.memory_space<vmem>>, vector<4x256xf32>
    %1 = vector.extract_strided_slice %0 {offsets = [0, 0], sizes = [1, 256], strides = [1, 1]} : vector<4x256xf32> to vector<1x256xf32>
    %2 = vector.extract_strided_slice %0 {offsets = [1, 0], sizes = [1, 256], strides = [1, 1]} : vector<4x256xf32> to vector<1x256xf32>
    %3 = vector.extract_strided_slice %0 {offsets = [2, 0], sizes = [1, 256], strides = [1, 1]} : vector<4x256xf32> to vector<1x256xf32>
    %4 = vector.extract_strided_slice %0 {offsets = [3, 0], sizes = [1, 256], strides = [1, 1]} : vector<4x256xf32> to vector<1x256xf32>
    %c0_1 = arith.constant 0 : index
    %c0_2 = arith.constant 0 : index
    %c0_3 = arith.constant 0 : index
    %5 = vector.load %arg1[%c0_1, %c0_2, %c0_3] : memref<1x4x256xbf16, #tpu.memory_space<vmem>>, vector<1x4x256xbf16>
    %6 = vector.shape_cast %5 : vector<1x4x256xbf16> to vector<4x256xbf16>
    %c0_4 = arith.constant 0 : index
    %c0_5 = arith.constant 0 : index
    %c0_6 = arith.constant 0 : index
    %7 = vector.load %arg2[%c0_4, %c0_5, %c0_6] : memref<1x4x256xbf16, #tpu.memory_space<vmem>>, vector<1x4x256xbf16>
    %8 = vector.shape_cast %7 : vector<1x4x256xbf16> to vector<4x256xbf16>
    %c0_7 = arith.constant 0 : index
    %c0_8 = arith.constant 0 : index
    %9 = vector.load %arg4[%c0_7, %c0_8] : memref<8x4xbf16, #tpu.memory_space<vmem>>, vector<8x4xbf16>
    %cst = arith.constant dense<0.000000e+00> : vector<8x256xf32>
    %10 = tpu.matmul %9, %6, %cst {dimension_numbers = #tpu.dot_dimension_numbers<[1], [0], [0], [1], [0, 0, 1, 1], [], []>} : vector<8x4xbf16>, vector<4x256xbf16>, vector<8x256xf32> -> vector<8x256xf32>
    %c0_9 = arith.constant 0 : index
    %c0_10 = arith.constant 0 : index
    %11 = vector.load %arg5[%c0_9, %c0_10] : memref<2x4xbf16, #tpu.memory_space<vmem>>, vector<2x4xbf16>
    %cst_11 = arith.constant dense<0.000000e+00> : vector<2x256xf32>
    %12 = tpu.matmul %11, %8, %cst_11 {dimension_numbers = #tpu.dot_dimension_numbers<[1], [0], [0], [1], [0, 0, 1, 1], [], []>} : vector<2x4xbf16>, vector<4x256xbf16>, vector<2x256xf32> -> vector<2x256xf32>
    %c16_i32 = arith.constant 16 : i32
    %13 = tpu.dynamic_rotate %10 by %c16_i32 dim 1 : vector<8x256xf32>, i32 -> vector<8x256xf32>
    %14 = vector.broadcast %3 : vector<1x256xf32> to vector<8x256xf32>
    %15 = arith.mulf %13, %14 : vector<8x256xf32>
    %c240_i32 = arith.constant 240 : i32
    %16 = tpu.dynamic_rotate %10 by %c240_i32 dim 1 : vector<8x256xf32>, i32 -> vector<8x256xf32>
    %17 = vector.broadcast %4 : vector<1x256xf32> to vector<8x256xf32>
    %18 = arith.mulf %16, %17 : vector<8x256xf32>
    %c1_i32 = arith.constant 1 : i32
    %19 = tpu.dynamic_rotate %15 by %c1_i32 dim 1 : vector<8x256xf32>, i32 -> vector<8x256xf32>
    %20 = vector.broadcast %1 : vector<1x256xf32> to vector<8x256xf32>
    %21 = arith.mulf %19, %20 : vector<8x256xf32>
    %c255_i32 = arith.constant 255 : i32
    %22 = tpu.dynamic_rotate %15 by %c255_i32 dim 1 : vector<8x256xf32>, i32 -> vector<8x256xf32>
    %23 = vector.broadcast %2 : vector<1x256xf32> to vector<8x256xf32>
    %24 = arith.mulf %22, %23 : vector<8x256xf32>
    %c1_i32_12 = arith.constant 1 : i32
    %25 = tpu.dynamic_rotate %10 by %c1_i32_12 dim 1 : vector<8x256xf32>, i32 -> vector<8x256xf32>
    %26 = vector.broadcast %1 : vector<1x256xf32> to vector<8x256xf32>
    %27 = arith.mulf %25, %26 : vector<8x256xf32>
    %c255_i32_13 = arith.constant 255 : i32
    %28 = tpu.dynamic_rotate %10 by %c255_i32_13 dim 1 : vector<8x256xf32>, i32 -> vector<8x256xf32>
    %29 = vector.broadcast %2 : vector<1x256xf32> to vector<8x256xf32>
    %30 = arith.mulf %28, %29 : vector<8x256xf32>
    %c1_i32_14 = arith.constant 1 : i32
    %31 = tpu.dynamic_rotate %18 by %c1_i32_14 dim 1 : vector<8x256xf32>, i32 -> vector<8x256xf32>
    %32 = vector.broadcast %1 : vector<1x256xf32> to vector<8x256xf32>
    %33 = arith.mulf %31, %32 : vector<8x256xf32>
    %c255_i32_15 = arith.constant 255 : i32
    %34 = tpu.dynamic_rotate %18 by %c255_i32_15 dim 1 : vector<8x256xf32>, i32 -> vector<8x256xf32>
    %35 = vector.broadcast %2 : vector<1x256xf32> to vector<8x256xf32>
    %36 = arith.mulf %34, %35 : vector<8x256xf32>
    %37 = tpu.concatenate %21, %15, %24, %27, %10, %30, %33, %18, %36 in 0 : vector<8x256xf32>, vector<8x256xf32>, vector<8x256xf32>, vector<8x256xf32>, vector<8x256xf32>, vector<8x256xf32>, vector<8x256xf32>, vector<8x256xf32>, vector<8x256xf32> -> vector<72x256xf32>
    %38 = arith.truncf %37 : vector<72x256xf32> to vector<72x256xbf16>
    %c0_16 = arith.constant 0 : index
    %c0_17 = arith.constant 0 : index
    %39 = vector.load %arg6[%c0_16, %c0_17] : memref<8x72xbf16, #tpu.memory_space<vmem>>, vector<8x72xbf16>
    %cst_18 = arith.constant dense<0.000000e+00> : vector<8x256xf32>
    %40 = tpu.matmul %39, %38, %cst_18 {dimension_numbers = #tpu.dot_dimension_numbers<[1], [0], [0], [1], [0, 0, 1, 1], [], []>} : vector<8x72xbf16>, vector<72x256xbf16>, vector<8x256xf32> -> vector<8x256xf32>
    %c0_19 = arith.constant 0 : index
    %c0_20 = arith.constant 0 : index
    %41 = vector.load %arg7[%c0_19, %c0_20] : memref<8x1xf32, #tpu.memory_space<vmem>>, vector<8x1xf32>
    %42 = vector.broadcast %41 : vector<8x1xf32> to vector<8x256xf32>
    %43 = arith.addf %40, %42 : vector<8x256xf32>
    %c0_21 = arith.constant 0 : index
    %c0_22 = arith.constant 0 : index
    %44 = vector.load %arg8[%c0_21, %c0_22] : memref<8x8xbf16, #tpu.memory_space<vmem>>, vector<8x8xbf16>
    %45 = arith.truncf %10 : vector<8x256xf32> to vector<8x256xbf16>
    %cst_23 = arith.constant dense<0.000000e+00> : vector<8x256xf32>
    %46 = tpu.matmul %44, %45, %cst_23 {dimension_numbers = #tpu.dot_dimension_numbers<[1], [0], [0], [1], [0, 0, 1, 1], [], []>} : vector<8x8xbf16>, vector<8x256xbf16>, vector<8x256xf32> -> vector<8x256xf32>
    %47 = arith.addf %43, %46 : vector<8x256xf32>
    %c0_24 = arith.constant 0 : index
    %c0_25 = arith.constant 0 : index
    %48 = vector.load %arg9[%c0_24, %c0_25] : memref<6x2xbf16, #tpu.memory_space<vmem>>, vector<6x2xbf16>
    %49 = arith.truncf %12 : vector<2x256xf32> to vector<2x256xbf16>
    %cst_26 = arith.constant dense<0.000000e+00> : vector<6x256xf32>
    %50 = tpu.matmul %48, %49, %cst_26 {dimension_numbers = #tpu.dot_dimension_numbers<[1], [0], [0], [1], [0, 0, 1, 1], [], []>} : vector<6x2xbf16>, vector<2x256xbf16>, vector<6x256xf32> -> vector<6x256xf32>
    %cst_27 = arith.constant dense<0.000000e+00> : vector<8xf32>
    %51 = vector.multi_reduction <add>, %47, %cst_27 [1] : vector<8x256xf32> to vector<8xf32>
    %52 = vector.shape_cast %51 : vector<8xf32> to vector<8x1xf32>
    %cst_28 = arith.constant 2.560000e+02 : f32
    %53 = vector.broadcast %cst_28 : f32 to vector<8x1xf32>
    %54 = arith.divf %52, %53 : vector<8x1xf32>
    %cst_29 = arith.constant dense<0.000000e+00> : vector<6xf32>
    %55 = vector.multi_reduction <add>, %50, %cst_29 [1] : vector<6x256xf32> to vector<6xf32>
    %56 = vector.shape_cast %55 : vector<6xf32> to vector<6x1xf32>
    %cst_30 = arith.constant 2.560000e+02 : f32
    %57 = vector.broadcast %cst_30 : f32 to vector<6x1xf32>
    %58 = arith.divf %56, %57 : vector<6x1xf32>
    %cst_31 = arith.constant dense<0.000000e+00> : vector<2xf32>
    %59 = vector.multi_reduction <add>, %12, %cst_31 [1] : vector<2x256xf32> to vector<2xf32>
    %60 = vector.shape_cast %59 : vector<2xf32> to vector<2x1xf32>
    %cst_32 = arith.constant 2.560000e+02 : f32
    %61 = vector.broadcast %cst_32 : f32 to vector<2x1xf32>
    %62 = arith.divf %60, %61 : vector<2x1xf32>
    %63 = tpu.concatenate %54, %58, %62 in 0 : vector<8x1xf32>, vector<6x1xf32>, vector<2x1xf32> -> vector<16x1xf32>
    %cst_33 = arith.constant dense<0xFF800000> : vector<1xf32>
    %64 = vector.multi_reduction <maximumf>, %63, %cst_33 [0] : vector<16x1xf32> to vector<1xf32>
    %65 = vector.shape_cast %64 : vector<1xf32> to vector<1x1xf32>
    %66 = vector.broadcast %65 : vector<1x1xf32> to vector<16x1xf32>
    %67 = arith.subf %63, %66 : vector<16x1xf32>
    %68 = math.exp %67 : vector<16x1xf32>
    %cst_34 = arith.constant dense<0.000000e+00> : vector<1xf32>
    %69 = vector.multi_reduction <add>, %68, %cst_34 [0] : vector<16x1xf32> to vector<1xf32>
    %70 = vector.shape_cast %69 : vector<1xf32> to vector<1x1xf32>
    %71 = tpu.reciprocal %70 {approx = true} : vector<1x1xf32> -> vector<1x1xf32>
    %72 = vector.broadcast %71 : vector<1x1xf32> to vector<16x1xf32>
    %73 = arith.mulf %68, %72 : vector<16x1xf32>
    %74 = vector.extract_strided_slice %73 {offsets = [8, 0], sizes = [6, 1], strides = [1, 1]} : vector<16x1xf32> to vector<6x1xf32>
    %75 = vector.broadcast %74 : vector<6x1xf32> to vector<6x256xf32>
    %76 = arith.mulf %50, %75 : vector<6x256xf32>
    %77 = vector.extract_strided_slice %73 {offsets = [14, 0], sizes = [2, 1], strides = [1, 1]} : vector<16x1xf32> to vector<2x1xf32>
    %78 = vector.broadcast %77 : vector<2x1xf32> to vector<2x256xf32>
    %79 = arith.mulf %12, %78 : vector<2x256xf32>
    %80 = tpu.concatenate %76, %79 in 0 : vector<6x256xf32>, vector<2x256xf32> -> vector<8x256xf32>
    %81 = vector.extract_strided_slice %73 {offsets = [0, 0], sizes = [8, 1], strides = [1, 1]} : vector<16x1xf32> to vector<8x1xf32>
    %82 = vector.broadcast %81 : vector<8x1xf32> to vector<8x256xf32>
    %83 = arith.mulf %47, %82 : vector<8x256xf32>
    %84 = arith.addf %83, %80 : vector<8x256xf32>
    %c0_35 = arith.constant 0 : index
    %c0_36 = arith.constant 0 : index
    %c0_37 = arith.constant 0 : index
    %85 = vector.load %arg10[%c0_35, %c0_36, %c0_37] : memref<1x8x256xf32, #tpu.memory_space<vmem>>, vector<1x8x256xf32>
    %86 = vector.shape_cast %85 : vector<1x8x256xf32> to vector<8x256xf32>
    %87 = vector.shape_cast %84 : vector<8x256xf32> to vector<1x8x256xf32>
    tpu.vector_store %arg10[%c0_35, %c0_36, %c0_37], %87 {strides = array<i32>} : memref<1x8x256xf32, #tpu.memory_space<vmem>>, vector<1x8x256xf32>,
    return
  }
  func.func @transform_0(%arg0: i32) -> (i32, i32, i32) {
    %c0_i32 = arith.constant 0 : i32
    %c0_i32_0 = arith.constant 0 : i32
    %c0_i32_1 = arith.constant 0 : i32
    return %arg0, %c0_i32, %c0_i32_0 : i32, i32, i32
  }
  func.func @transform_1(%arg0: i32) -> (i32, i32, i32) {
    %c0_i32 = arith.constant 0 : i32
    %c0_i32_0 = arith.constant 0 : i32
    %c0_i32_1 = arith.constant 0 : i32
    return %arg0, %c0_i32, %c0_i32_0 : i32, i32, i32
  }
  func.func @transform_2(%arg0: i32) -> (i32, i32) {
    %c0_i32 = arith.constant 0 : i32
    %c0_i32_0 = arith.constant 0 : i32
    %c0_i32_1 = arith.constant 0 : i32
    return %c0_i32, %c0_i32_0 : i32, i32
  }
  func.func @transform_3(%arg0: i32) -> (i32, i32) {
    %c0_i32 = arith.constant 0 : i32
    %c0_i32_0 = arith.constant 0 : i32
    %c0_i32_1 = arith.constant 0 : i32
    return %c0_i32, %c0_i32_0 : i32, i32
  }
  func.func @transform_4(%arg0: i32) -> (i32, i32) {
    %c0_i32 = arith.constant 0 : i32
    %c0_i32_0 = arith.constant 0 : i32
    %c0_i32_1 = arith.constant 0 : i32
    return %c0_i32, %c0_i32_0 : i32, i32
  }
  func.func @transform_5(%arg0: i32) -> (i32, i32) {
    %c0_i32 = arith.constant 0 : i32
    %c0_i32_0 = arith.constant 0 : i32
    %c0_i32_1 = arith.constant 0 : i32
    return %c0_i32, %c0_i32_0 : i32, i32
  }
  func.func @transform_6(%arg0: i32) -> (i32, i32) {
    %c0_i32 = arith.constant 0 : i32
    %c0_i32_0 = arith.constant 0 : i32
    %c0_i32_1 = arith.constant 0 : i32
    return %c0_i32, %c0_i32_0 : i32, i32
  }
  func.func @transform_7(%arg0: i32) -> (i32, i32) {
    %c0_i32 = arith.constant 0 : i32
    %c0_i32_0 = arith.constant 0 : i32
    %c0_i32_1 = arith.constant 0 : i32
    return %c0_i32, %c0_i32_0 : i32, i32
  }
  func.func @transform_8(%arg0: i32) -> (i32, i32) {
    %c0_i32 = arith.constant 0 : i32
    %c0_i32_0 = arith.constant 0 : i32
    %c0_i32_1 = arith.constant 0 : i32
    return %c0_i32, %c0_i32_0 : i32, i32
  }
  func.func @transform_9(%arg0: i32) -> (i32, i32, i32) {
    %c0_i32 = arith.constant 0 : i32
    %c0_i32_0 = arith.constant 0 : i32
    %c0_i32_1 = arith.constant 0 : i32
    return %arg0, %c0_i32, %c0_i32_0 : i32, i32, i32
  }
}

</mosaic_0001>

<bundles_post_ra>
// kernel: tpu_custom_call.1
= control target key start
LH: loop header
LB: loop body
LE: loop exit
PB: predicated region body
PF: predicated region fallthrough
CT: control target
= control target key end

     0   :  { %14 = vsyncpa [#allocation3], 0  ;;  %s1537_s0 = inlined_call_operand.vmem [shape: bf16[2,4,256], index: 0, kind: input, shape index: {}]   ;;  %s1538_s1 = inlined_call_operand.vmem [shape: bf16[2,4,256], index: 1, kind: input, shape index: {}]   ;;  %s1539_s2 = inlined_call_operand.vmem [shape: f32[4,256], index: 2, kind: input, shape index: {}]   ;;  %s1540_s3 = inlined_call_operand.vmem [shape: bf16[8,4], index: 3, kind: input, shape index: {}]   ;;  %s1541_s4 = inlined_call_operand.hbm [shape: bf16[2,4], index: 4, kind: input, shape index: {}]   ;;  %s1542_s5 = inlined_call_operand.vmem [shape: bf16[8,72], index: 5, kind: input, shape index: {}]   ;;  %s1543_s6 = inlined_call_operand.vmem [shape: f32[8,1], index: 6, kind: input, shape index: {}]   ;;  %s1544_s7 = inlined_call_operand.vmem [shape: bf16[8,8], index: 7, kind: input, shape index: {}]   ;;  %s1545_s8 = inlined_call_operand.vmem [shape: bf16[6,2], index: 8, kind: input, shape index: {}]   ;;  %s1546_s9 = inlined_call_operand.hbm [shape: f32[2,8,256], index: 9, kind: output, shape index: {}]  }
   0x1   :  { %15 = vsyncpa [#allocation4], 0 }
   0x2   :  { %17 = vsyncpa [#allocation4 + $0x1], 0  ;;  %s1242_s30 = smov 0   ;;  %s1244_s10 = smov 0  }
   0x3   :  { %s1246_s11 = smov 0   ;;  %s1248_s12 = smov 0  }
   0x4 LB: > { %s1263_s13 = sadd.s32 4294967295, %s1183_s12   ;;  %s991_s14 = sadd.s32 4294967294, %s1183_s12   ;;  %s1183_s12 = sphi %s1248_s12, %s1562_s12   ;;  %s1179_s11 = sphi %s1246_s11, %s1561_s11   ;;  %s1175_s10 = sphi %s1244_s10, %s1560_s10   ;;  %s1171_s30 = sphi %s1242_s30, %s1559_s30  }
   0x5   : > { %s1267_s15 = sadd.s32 1, %s1183_s12   ;;  %s229_s16 = sadd.s32 1, %s1179_s11 }
   0x6   : > { %s226_s17 = ssub.s32 %s1183_s12, %s1267_s15  ;;  %p239_p0 = scmp.ne.s32.totalorder %s1179_s11, %s1175_s10 }
   0x7   : > { %p227_p1 = scmp.eq.s32.totalorder %s226_s17, 0  ;;  %p240_p2 = scmp.eq.s32.totalorder %s1263_s13, 1 }
   0x8   : > { %p245_p3 = scmp.ne.s32.totalorder %s1175_s10, %s1171_s30  ;;  %p246_p4 = scmp.eq.s32.totalorder %s991_s14, 1 }
   0x9   : > { %s1278_s18 = scalar_select %p227_p1, %s1179_s11, %s229_s16  }
   0xa   : > { %p1280_p5 = por %p240_p2, %p239_p0  ;;  %p1284_p6 = por %p246_p4, %p245_p3 }
   0xb   : > { %p992_p7 = scmp.ge.s32.totalorder %s1183_s12, 1  ;;  %p253_p8 = scmp.lt.s32.totalorder %s1183_s12, 3 }
   0xc   : > { %s1550_s19 = scalar_select %p1280_p5, 1, 0 }
   0xd   : > { %s1551_s20 = scalar_select %p1284_p6, 1, 0 }
   0xe   : > { %p1547_p9 = scmp.eq.s32.totalorder %s1263_s13, 0  ;;  %p1291_p10 = pnand %p992_p7, %p253_p8 }
   0xf   : > { %s1185_s22 = smov [#allocation2]   ;;  %s1089_s27 = scalar_lea.hbm %s1541_s4, 16 }
  0x10   : > { %s1552_s21 = scalar_select %p1291_p10, 1, 0 }
  0x11   : > { %s272_s23 = sshll.u32 %s1185_s22, 4  ;;  %p1032_p11 = pneg %p1291_p10  ;;  %s273_s23 = int_to_ptr.vmem [resolvable:$true] %s272_s23 }
  0x12   : > { %p1090_p13 = scmp.ne.s32.totalorder %s1541_s4, %s1089_s27  ;;  %p1096_p3 = scmp.lt.u32.totalorder %s1089_s27, %s1541_s4 }
  0x13   : > { %p1299_p12 = pnand %p1547_p9, %p1032_p11 }
  0x15   : > { %p1091_p0 = pneg %p1299_p12 }
  0x17   : > { %p1092_p1 = pnand %p1091_p0, %p1090_p13 }
  0x19   : > { %p1093_p2 = pneg %p1092_p1 }
  0x1b   : > { %p1098_p4 = pnand %p1096_p3, %p1093_p2 }
  0x1d   : > { %1101 = shalt.err (!%p1098_p4)
}
  0x1e   : > { %s1102_s17 = scalar_lea.vmem %s273_s23, 16  ;;  %s1109_s22 = scalar_lea.vmem %s273_s23, 32 }
  0x1f   : > { %p1103_p7 = scmp.ne.s32.totalorder %s273_s23, %s1102_s17  ;;  %p1110_p9 = scmp.lt.s32.totalorder %s273_s23, %s273_s23 }
  0x20   : > { %p1111_p6 = scmp.lt.s32.totalorder %s1109_s22, %s1102_s17 }
  0x21   : > { %p1105_p8 = pnand %p1103_p7, %p1091_p0 }
  0x22   : > { %p1112_p5 = por %p1111_p6, %p1110_p9 }
  0x23   : > { %p1106_p11 = pneg %p1105_p8 }
  0x25   : > { %p1113_p10 = pnand %p1112_p5, %p1106_p11 }
  0x27   : > { %1116 = shalt.err (!%p1113_p10)
}
  0x28   : > { %1035 = dma.hbm_to_vmem [thread:$0]  (!%p1299_p12), %s1541_s4, 16, %s273_s23, [#allocation3]  }
  0x29   : > { %p1554_p13 = scmp.ne.s32.totalorder %s1552_s21, 0 }
  0x2a   : > { %p1555_p1 = scmp.eq.s32.totalorder (!%p1554_p13), %s1263_s13, 0 }
  0x2b   : > { %313 = sbr.rel (%p1554_p13) target bundleno = 1111 (0x457), region = 56 }
  0x32   : > { %1162 = dma.done.wait (%p1555_p1), [#allocation3], 16   ;;  %p1556_p0 = pmov %p1555_p1 }
  0x33   : > { %p354_p6 = scmp.lt.s32.totalorder %s1263_s13, 1  ;;  %v1186_v0 = vmov 0   ;;  %vm382_vm0 = vcmask 1041408   ;;  %v368_v7 = vld [vmem:[%s1540_s3] sm:$0xf]  ;;  %vm378_vm1 = vcmask 31744   ;;  %v494_v25 = vlaneseq }
  0x34   : > { %1164 = vsyncadd (%p1556_p0), [#allocation3], 4294967280  ;;  %421 = vmatprep.mubr.bf16.mxu0 %v1186_v0  ;;  %481 = vmatprep.mubr.bf16.mxu1 %v1186_v0  ;;  %v430_v8 = vld [vmem:[#allocation2] sm:$0x1]  ;;  %vm654_vm2 = vcmask 1043456   ;;  %s1187_s25 = smov 112  }
  0x35   : > { %s355_s24 = scalar_select %p354_p6, %s1263_s13, 1  ;;  %1081 = vset.pattern.permute.xlu0 %v1186_v0  ;;  %1082 = vset.pattern.permute.xlu1 %v1186_v0  ;;  %vm765_vm3 = vcmask 1040384   ;;  %v702_v22 = vld [vmem:[%s1544_s7] sm:$0xf]  ;;  %vm705_vm4 = vcmask 64512   ;;  %vm761_vm5 = vcmask 15360  }
  0x36   : > { %s1188_s26 = smov 16   ;;  %s1189_s23 = smov 1   ;;  %v758_v24 = vld [vmem:[%s1545_s8] sm:$0x7]  ;;  %v1372_v26 = vshrl.u32 %v494_v25, 7  ;;  %v1381_v30 = vand.u32 127, %v494_v25 }
  0x37   : > { %s1019_s27 = sshll.u32 %s355_s24, 2  ;;  %v1379_v29 = vld [vmem:[%s1539_s2] sm:$0xff]  ;;  %vm818_vm8 = vcmask 1045504   ;;  %vm650_vm11 = vcmask 588800   ;;  %vm835_vm12 = vcmask 7168   ;;  %s351_s24 = sand.u32 1, %s1175_s10  }
  0x38   : > { %s358_s21 = scalar_lea.vmem %s1537_s0, %s1019_s27  ;;  %s363_s16 = scalar_lea.vmem %s1538_s1, %s1019_s27  ;;  %v502_v27 = vsub.s32 2, %v1372_v26  ;;  %v506_v28 = vsub.s32 6, %v1372_v26  ;;  %vm496_vm6 = vcmp.lt.s32.totalorder %v1381_v30, 16  ;;  %v529_v40 = vsub.s32 3, %v1372_v26  ;;  %v644_v56 = vld [vmem:[%s1543_s6] sm:$0xff] }
  0x39   : > { %v1002_v1 = vld.sshfl [vmem:[%s358_s21] sm:$0x33 pattern:$0x76325410]  ;;  %v533_v41 = vsub.s32 7, %v1372_v26  ;;  %vm524_vm7 = vcmp.lt.s32.totalorder %v1381_v30, 112 }
  0x3a   : > { %v377_v2 = vcombine.high %v1002_v1, %v1002_v1  ;;  %v384_v3 = vsel %vm382_vm0, %v1002_v1, 0  ;;  %v1005_v4 = vld.sshfl [vmem:[%s363_s16] sm:$0x33 pattern:$0x76325410]  ;;  %v503_v31 = vrot.slane %v1379_v29, %v502_v27  ;;  %v507_v32 = vrot.slane %v1379_v29, %v506_v28  ;;  %s1190_s16 = smov 127  }
  0x3b   : > { %v439_v5 = vcombine.high %v1005_v4, %v1005_v4  ;;  %v444_v6 = vsel %vm382_vm0, %v1005_v4, 0  ;;  %v530_v44 = vrot.slane %v1379_v29, %v529_v40  ;;  %v534_v45 = vrot.slane %v1379_v29, %v533_v41  ;;  %s997_s27 = sshll.u32 %s351_s24, 4  ;;  %p1557_p9 = scmp.ne.s32.totalorder %s1550_s19, 0 }
  0x3c   : > { %1003 = vmatprep.subr.msk.bf16.mxu0 %vm382_vm0, %v377_v2  ;;  %v513_v34 = vrot.slane %v503_v31, %v502_v27  ;;  %v517_v35 = vrot.slane %v507_v32, %v502_v27  ;;  %v556_v61 = vsub.s32 0, %v1372_v26  ;;  %v560_v62 = vsub.s32 4, %v1372_v26  ;;  %s353_s28 = scalar_lea.vmem [#allocation5], %s997_s27  ;;  %s1191_s22 = smov [#allocation5]  }
  0x3d   : > { %390 = vmatpush1.bf16.msra.mxu0 %v384_v3  ;;  %1006 = vmatprep.subr.msk.bf16.mxu1 %vm382_vm0, %v439_v5  ;;  %v540_v47 = vrot.slane %v530_v44, %v529_v40  ;;  %v544_v48 = vrot.slane %v534_v45, %v529_v40  ;;  %v583_v2 = vsub.s32 1, %v1372_v26  ;;  %v587_v3 = vsub.s32 5, %v1372_v26  ;;  %s908_s21 = sshll.u32 %s353_s28, 4  ;;  %s1497_s21 = int_to_ptr.vmem [resolvable:$true] %s908_s21 }
  0x3e   : > { %450 = vmatpush1.bf16.msra.mxu1 %v444_v6  ;;  %vm551_vm9 = vcmp.lt.s32.totalorder %v1381_v30, 1  ;;  %vm578_vm10 = vcmp.lt.s32.totalorder %v1381_v30, 127  ;;  %s1117_s17 = scalar_lea.vmem %s1497_s21, 256 }
  0x3f   : > { %p1118_p5 = scmp.ne.s32.totalorder %s1497_s21, %s1117_s17 }
  0x40   : > { %1004 = vmatmul.mubr.msk.bf16.vlgmr.msra.gmra.mrb[0].mxu0 %vm378_vm1, %v368_v7 }
  0x41   : > { %1007 = vmatmul.mubr.msk.bf16.vlgmr.msra.gmra.mrb[0].mxu1 %vm378_vm1, %v430_v8  ;;  %693 = vmatprep.mubr.bf16.mxu0 %v1186_v0  ;;  %p1119_p10 = pnand %p1118_p5, %p1557_p9 }
  0x42   : > { %747 = vmatprep.mubr.bf16.mxu1 %v1186_v0 }
  0x43   : > { %p1120_p12 = pneg %p1119_p10 }
 0x113   : > { %v1340_v9 = vpop.f32.mrb[0].mxu0 }
 0x114   : > { %520 = vrot.lane.b32.xlu1 %v1340_v9, %s1187_s25  ;;  %490 = vrot.lane.b32.xlu0 %v1340_v9, %s1188_s26  ;;  %v1344_v10 = vpop.f32.mrb[1].mxu0  ;;  %v703_v11 = vpack.c.bf16 %v1340_v9, %v1340_v9  ;;  %v1348_v12 = vpop.f32.mrb[0].mxu1 }
 0x115   : > { %v427_v13 = vpop.f32.mrb[2].mxu0  ;;  %v704_v14 = vpack.c.bf16 %v1344_v10, %v1344_v10  ;;  %v1352_v15 = vpop.f32.mrb[1].mxu1  ;;  %v759_v20 = vpack.c.bf16 %v1348_v12, %v1348_v12  ;;  %v825_v49 = vsel %vm382_vm0, %v1348_v12, 0.0 }
 0x116   : > { %v428_v16 = vpop.f32.mrb[3].mxu0  ;;  %v710_v17 = vsel %vm654_vm2, %v703_v11, 0  ;;  %v760_v18 = vpack.c.bf16 %v1352_v15, %v1352_v15  ;;  %v487_v19 = vpop.f32.mrb[2].mxu1  ;;  %v826_v50 = vsel %vm382_vm0, %v1352_v15, 0.0  ;;  %v557_v13 = vrot.slane %v1379_v29, %v556_v61 }
 0x117   : > { %1010 = vmatprep.subr.msk.bf16.mxu1 %vm654_vm2, %v704_v14  ;;  %v488_v21 = vpop.f32.mrb[3].mxu1  ;;  %v767_v23 = vsel %vm765_vm3, %v759_v20, 0  ;;  %v827_v53 = vadd.f32 %v826_v50, %v825_v49  ;;  %v561_v14 = vrot.slane %v1379_v29, %v560_v62  ;;  %v584_v16 = vrot.slane %v1379_v29, %v583_v2 }
 0x118   : > { %522 = vrot.lane.b32.xlu1 %v1344_v10, %s1187_s25  ;;  %492 = vrot.lane.b32.xlu0 %v1344_v10, %s1188_s26  ;;  %s1121_s25 = sshll.u32 %s1191_s22, 4  ;;  %s1122_s25 = int_to_ptr.vmem [resolvable:$false] %s1121_s25 }
 0x119   : > { %716 = vmatpush1.bf16.msra.mxu1 %v710_v17  ;;  %v588_v17 = vrot.slane %v1379_v29, %v587_v3  ;;  %v571_v19 = vrot.slane %v561_v14, %v556_v61  ;;  %v594_v26 = vrot.slane %v584_v16, %v583_v2  ;;  %s1123_s26 = scalar_lea.vmem %s1122_s25, 512  ;;  %p1124_p2 = scmp.lt.s32.totalorder %s1497_s21, %s1122_s25 }
 0x11a   : > { %1012 = vmatprep.subr.msk.bf16.mxu1 %vm765_vm3, %v760_v18  ;;  %v567_v18 = vrot.slane %v557_v13, %v556_v61  ;;  %p1125_p3 = scmp.lt.s32.totalorder %s1123_s26, %s1117_s17 }
 0x11b   : > { %v598_v27 = vrot.slane %v588_v17, %v583_v2 }
 0x11c   : > { %603 = vrot.lane.b32.xlu1 %v1344_v10, %s1189_s23  ;;  %601 = vrot.lane.b32.xlu0 %v1340_v9, %s1189_s23  ;;  %p1126_p4 = por %p1125_p3, %p1124_p2 }
 0x11d   : > { %1011 = vmatmul.mubr.msk.bf16.vlgmr.msra.gmra.mrb[4].mxu1 %vm705_vm4, %v702_v22 }
 0x11e   : > { %773 = vmatpush1.bf16.msra.mxu1 %v767_v23  ;;  %804 = vmatprep.mubr.bf16.mxu1 %v1186_v0  ;;  %p1127_p7 = pnand %p1126_p4, %p1120_p12 }
 0x125   : > { %1013 = vmatmul.mubr.msk.bf16.vlgmr.msra.gmra.mrb[8].mxu1 %vm761_vm5, %v758_v24 }
 0x186   : > { %v491_v33 = vpop.permute.xlu0 %490  ;;  %v521_v39 = vpop.permute.xlu1 %520 }
 0x18a   : > { %v493_v36 = vpop.permute.xlu0 %492  ;;  %v523_v46 = vpop.permute.xlu1 %522 }
 0x18b   : > { %v497_v37 = vsel %vm496_vm6, %v491_v33, %v493_v36  ;;  %v498_v38 = vsel %vm496_vm6, %v493_v36, %v491_v33  ;;  %v525_v51 = vsel %vm524_vm7, %v521_v39, %v523_v46  ;;  %v526_v52 = vsel %vm524_vm7, %v523_v46, %v521_v39 }
 0x18c   : > { %v1388_v42 = vmul.f32 %v513_v34, %v498_v38  ;;  %v1390_v43 = vmul.f32 %v517_v35, %v497_v37  ;;  %v1407_v54 = vmul.f32 %v540_v47, %v525_v51  ;;  %v1409_v55 = vmul.f32 %v544_v48, %v526_v52 }
 0x18e   : > { %549 = vrot.lane.b32.xlu1 %v1390_v43, %s1189_s23  ;;  %547 = vrot.lane.b32.xlu0 %v1388_v42, %s1189_s23  ;;  %v604_v8 = vpop.permute.xlu1 %603  ;;  %v602_v11 = vpop.permute.xlu0 %601 }
 0x18f   : > { %v605_v28 = vsel %vm551_vm9, %v602_v11, %v604_v8  ;;  %v606_v29 = vsel %vm551_vm9, %v604_v8, %v602_v11 }
 0x190   : > { %v607_v37 = vmul.f32 %v606_v29, %v567_v18  ;;  %v608_v38 = vmul.f32 %v605_v28, %v571_v19 }
 0x192   : > { %576 = vrot.lane.b32.xlu1 %v1390_v43, %s1190_s16  ;;  %574 = vrot.lane.b32.xlu0 %v1388_v42, %s1190_s16 }
 0x196   : > { %611 = vrot.lane.b32.xlu1 %v1344_v10, %s1190_s16  ;;  %609 = vrot.lane.b32.xlu0 %v1340_v9, %s1190_s16 }
 0x19a   : > { %619 = vrot.lane.b32.xlu1 %v1409_v55, %s1189_s23  ;;  %617 = vrot.lane.b32.xlu0 %v1407_v54, %s1189_s23  ;;  %s1021_s23 = sshll.u32 %s1263_s13, 8  ;;  %s894_s13 = scalar_lea.sflag [#allocation4], %s351_s24 }
 0x19e   : > { %627 = vrot.lane.b32.xlu1 %v1409_v55, %s1190_s16  ;;  %625 = vrot.lane.b32.xlu0 %v1407_v54, %s1190_s16  ;;  %s1495_s16 = scalar_lea.hbm %s1546_s9, %s1021_s23 }
 0x1a2   : > { %647 = vperm.xlu0 %1081, %v644_v56  }
 0x1c2   : > { %828 = vadd.xlane.f32.xlu1 %v827_v53 }
 0x1f0   : > { %v1420_v57 = vpop.f32.mrb[4].mxu1 }
 0x1f1   : > { %v1422_v58 = vpop.f32.mrb[5].mxu1 }
 0x1f2   : > { %v753_v59 = vpop.f32.mrb[6].mxu1 }
 0x1f3   : > { %v754_v60 = vpop.f32.mrb[7].mxu1 }
 0x1f8   : > { %v1426_v63 = vpop.f32.mrb[8].mxu1 }
 0x1f9   : > { %v819_v0 = vsel %vm818_vm8, %v1426_v63, 0.0  ;;  %v1430_v1 = vpop.f32.mrb[9].mxu1 }
 0x1fa   : > { %v820_v4 = vsel %vm818_vm8, %v1430_v1, 0.0  ;;  %v810_v5 = vpop.f32.mrb[10].mxu1 }
 0x1fb   : > { %v821_v6 = vadd.f32 %v820_v4, %v819_v0  ;;  %v811_v7 = vpop.f32.mrb[11].mxu1 }
 0x1fd   : > { %822 = vadd.xlane.f32.xlu0 %v821_v6 }
 0x200   : > { %v550_v20 = vpop.permute.xlu1 %549  ;;  %v548_v21 = vpop.permute.xlu0 %547 }
 0x201   : > { %v552_v22 = vsel %vm551_vm9, %v548_v21, %v550_v20  ;;  %v553_v23 = vsel %vm551_vm9, %v550_v20, %v548_v21 }
 0x202   : > { %v572_v24 = vmul.f32 %v567_v18, %v553_v23  ;;  %v573_v25 = vmul.f32 %v571_v19, %v552_v22 }
 0x204   : > { %v633_v31 = vpack.c.bf16 %v1388_v42, %v572_v24  ;;  %v577_v32 = vpop.permute.xlu1 %576  ;;  %v575_v33 = vpop.permute.xlu0 %574  ;;  %v634_v34 = vpack.c.bf16 %v1390_v43, %v573_v25 }
 0x205   : > { %v579_v35 = vsel %vm578_vm10, %v575_v33, %v577_v32  ;;  %v580_v36 = vsel %vm578_vm10, %v577_v32, %v575_v33 }
 0x206   : > { %v599_v39 = vmul.f32 %v594_v26, %v579_v35  ;;  %v600_v40 = vmul.f32 %v598_v27, %v580_v36  ;;  %661 = vmatprep.subr.bf16.mxu0 %v634_v34 }
 0x207   : > { %662 = vmatpush1.bf16.msra.mxu0 %v633_v31 }
 0x208   : > { %v635_v41 = vpack.c.bf16 %v607_v37, %v599_v39  ;;  %v612_v44 = vpop.permute.xlu1 %611  ;;  %v610_v45 = vpop.permute.xlu0 %609  ;;  %v636_v42 = vpack.c.bf16 %v608_v38, %v600_v40 }
 0x209   : > { %v613_v46 = vsel %vm578_vm10, %v610_v45, %v612_v44  ;;  %v614_v43 = vsel %vm578_vm10, %v612_v44, %v610_v45 }
 0x20a   : > { %v615_v47 = vmul.f32 %v613_v46, %v594_v26  ;;  %v616_v48 = vmul.f32 %v614_v43, %v598_v27  ;;  %663 = vmatprep.subr.bf16.mxu0 %v636_v42 }
 0x20b   : > { %664 = vmatpush1.bf16.msra.mxu0 %v635_v41 }
 0x20c   : > { %v637_v49 = vpack.c.bf16 %v615_v47, %v1340_v9  ;;  %v620_v50 = vpop.permute.xlu1 %619  ;;  %v618_v51 = vpop.permute.xlu0 %617  ;;  %v638_v52 = vpack.c.bf16 %v616_v48, %v1344_v10 }
 0x20d   : > { %v621_v53 = vsel %vm551_vm9, %v618_v51, %v620_v50  ;;  %v622_v56 = vsel %vm551_vm9, %v620_v50, %v618_v51 }
 0x20e   : > { %v623_v59 = vmul.f32 %v622_v56, %v567_v18  ;;  %v624_v60 = vmul.f32 %v621_v53, %v571_v19  ;;  %665 = vmatprep.subr.bf16.mxu0 %v638_v52 }
 0x20f   : > { %666 = vmatpush1.bf16.msra.mxu0 %v637_v49 }
 0x210   : > { %v639_v61 = vpack.c.bf16 %v1407_v54, %v623_v59  ;;  %v628_v62 = vpop.permute.xlu1 %627  ;;  %v626_v0 = vpop.permute.xlu0 %625  ;;  %v640_v9 = vpack.c.bf16 %v1409_v55, %v624_v60  ;;  %v643_v55 = vld [vmem:[%s1542_s5] sm:$0xf] }
 0x211   : > { %v629_v2 = vsel %vm578_vm10, %v626_v0, %v628_v62  ;;  %v630_v10 = vsel %vm578_vm10, %v628_v62, %v626_v0 }
 0x212   : > { %v631_v3 = vmul.f32 %v629_v2, %v594_v26  ;;  %v632_v4 = vmul.f32 %v630_v10, %v598_v27  ;;  %667 = vmatprep.subr.bf16.mxu0 %v640_v9 }
 0x213   : > { %668 = vmatpush1.bf16.msra.mxu0 %v639_v61 }
 0x214   : > { %v641_v5 = vpack.c.bf16 %v631_v3, %v631_v3  ;;  %v642_v6 = vpack.c.bf16 %v632_v4, %v632_v4 }
 0x216   : > { %1008 = vmatprep.subr.msk.bf16.mxu0 %vm654_vm2, %v642_v6  ;;  %v656_v54 = vsel %vm654_vm2, %v641_v5, 0 }
 0x217   : > { %670 = vmatpush1.bf16.msra.mxu0 %v656_v54 }
 0x21a   : > { %1009 = vmatmul.mubr.msk.bf16.vlgmr.msra.gmra.mrb[4].mxu0 %vm650_vm11, %v643_v55 }
 0x221   : > { %v648_v7 = vpop.permute.xlu0 %647 }
 0x24f   : > { %v829_v20 = vpop.xlane.xlu1 %828 }
 0x250   : > { %v830_v21 = vmul.f32 0.00390625, %v829_v20 }
 0x252   : > { %v832_v23 = vrot.slane %v830_v21, 2 }
 0x28a   : > { %v823_v22 = vpop.xlane.xlu0 %822 }
 0x28b   : > { %v824_v24 = vmul.f32 0.00390625, %v823_v22 }
 0x28d   : > { %v834_v25 = vsel %vm818_vm8, %v824_v24, %v832_v23 }
 0x28e   : > { %v837_v29 = vsel %vm835_vm12, %v834_v25, -inf }
 0x2ed   : > { %v695_v30 = vpop.f32.mrb[4].mxu0 }
 0x2ee   : > { %v696_v8 = vadd.f32 %v695_v30, %v648_v7  ;;  %v697_v11 = vpop.f32.mrb[5].mxu0 }
 0x2ef   : > { %v698_v13 = vadd.f32 %v697_v11, %v648_v7  ;;  %v699_v14 = vpop.f32.mrb[6].mxu0 }
 0x2f0   : > { %v756_v16 = vadd.f32 %v1420_v57, %v696_v8  ;;  %v700_v17 = vpop.f32.mrb[7].mxu0 }
 0x2f1   : > { %v757_v18 = vadd.f32 %v1422_v58, %v698_v13 }
 0x2f3   : > { %v813_v19 = vadd.f32 %v757_v18, %v756_v16 }
 0x2f5   : > { %814 = vadd.xlane.f32.xlu1 %v813_v19 }
 0x382   : > { %v815_v26 = vpop.xlane.xlu1 %814 }
 0x383   : > { %v817_v27 = vmul.f32 0.00390625, %v815_v26 }
 0x385   : > { %v836_v28 = vsel %vm835_vm12, %v817_v27, -inf }
 0x386   : > { %v838_v57 = vmax.f32 %v836_v28, %v837_v29 }
 0x388   : > { %v839_v31 = vrot.slane %v838_v57, 4 }
 0x38a   : > { %v840_v32 = vmax.f32 %v838_v57, %v839_v31 }
 0x38c   : > { %v841_v58 = vrot.slane %v840_v32, 2 }
 0x38e   : > { %v842_v33 = vmax.f32 %v840_v32, %v841_v58 }
 0x390   : > { %v843_v34 = vrot.slane %v842_v33, 1 }
 0x392   : > { %v844_v35 = vmax.f32 %v842_v33, %v843_v34 }
 0x394   : > { %v845_v36 = vsub.f32 %v817_v27, %v844_v35  ;;  %v846_v37 = vsub.f32 %v834_v25, %v844_v35 }
 0x396   : > { %v847_v38 = vmul.f32 1.442695, %v845_v36  ;;  %v849_v39 = vmul.f32 1.442695, %v846_v37 }
 0x398   : > { %1083 = vpow2.f32 %v847_v38 }
 0x399   : > { %1085 = vpow2.f32 %v849_v39 }
 0x3a2   : > { %v1084_v40 = vpop.eup %1083 }
 0x3a3   : > { %v1086_v41 = vpop.eup %1085  ;;  %v851_v44 = vsel %vm835_vm12, %v1084_v40, 0.0 }
 0x3a4   : > { %v852_v45 = vsel %vm835_vm12, %v1086_v41, 0.0 }
 0x3a5   : > { %v853_v42 = vadd.f32 %v852_v45, %v851_v44 }
 0x3a7   : > { %v854_v46 = vrot.slane %v853_v42, 4 }
 0x3a9   : > { %v855_v43 = vadd.f32 %v854_v46, %v853_v42 }
 0x3ab   : > { %v856_v47 = vrot.slane %v855_v43, 2 }
 0x3ad   : > { %v857_v48 = vadd.f32 %v856_v47, %v855_v43 }
 0x3af   : > { %v858_v49 = vrot.slane %v857_v48, 1 }
 0x3b1   : > { %v859_v50 = vadd.f32 %v858_v49, %v857_v48 }
 0x3b3   : > { %1087 = vrcp.f32 %v859_v50 }
 0x3bd   : > { %v1088_v51 = vpop.eup %1087 }
 0x3be   : > { %v862_v52 = vmul.f32 %v1088_v51, %v1086_v41  ;;  %v861_v53 = vmul.f32 %v1088_v51, %v1084_v40 }
 0x3c0   : > { %865 = vperm.xlu0 %1081, %v862_v52   ;;  %884 = vperm.xlu1 %1082, %v861_v53  }
 0x43f   : > { %v866_v56 = vpop.permute.xlu0 %865  ;;  %v885_v62 = vpop.permute.xlu1 %884 }
 0x440   : > { %v870_v59 = vrot.slane %v866_v56, 6  ;;  %v868_v0 = vmul.f32 %v866_v56, %v1426_v63  ;;  %v869_v9 = vmul.f32 %v866_v56, %v1430_v1  ;;  %v887_v3 = vmul.f32 %v885_v62, %v756_v16 }
 0x441   : > { %v888_v4 = vmul.f32 %v885_v62, %v757_v18 }
 0x442   : > { %v872_v60 = vmul.f32 %v870_v59, %v1348_v12  ;;  %v873_v61 = vmul.f32 %v870_v59, %v1352_v15 }
 0x444   : > { %v876_v2 = vrot.slane %v872_v60, 2  ;;  %v877_v10 = vrot.slane %v873_v61, 2 }
 0x446   : > { %v880_v5 = vsel %vm818_vm8, %v868_v0, %v876_v2  ;;  %v881_v6 = vsel %vm818_vm8, %v869_v9, %v877_v10 }
 0x447   : > { %v889_v12 = vadd.f32 %v887_v3, %v880_v5  ;;  %v890_v54 = vadd.f32 %v888_v4, %v881_v6 }
 0x449   : > { %891 = vst [vmem:[%s353_s28] sm:$0xff] %v889_v12  ;;  %892 = vst [vmem:[%s353_s28 + $0x8] sm:$0xff] %v890_v54 }
 0x44a   : > { %1130 = shalt.err (!%p1127_p7)
}
 0x44b   : > { %s1131_s24 = scalar_lea.hbm %s1495_s16, 256  ;;  %s1135_s28 = scalar_lea.hbm %s1546_s9, 512 }
 0x44c   : > { %p1132_p8 = scmp.ne.s32.totalorder %s1495_s16, %s1131_s24  ;;  %p1136_p1 = scmp.lt.u32.totalorder %s1495_s16, %s1546_s9 }
 0x44d   : > { %p1137_p0 = scmp.lt.u32.totalorder %s1135_s28, %s1131_s24  ;;  %p1139_p5 = scmp.lt.u32.totalorder %s1131_s24, %s1495_s16 }
 0x44e   : > { %p1133_p11 = pnand %p1132_p8, %p1557_p9 }
 0x44f   : > { %p1138_p6 = por %p1137_p0, %p1136_p1 }
 0x450   : > { %p1134_p13 = pneg %p1133_p11 }
 0x451   : > { %p1140_p10 = por %p1139_p5, %p1138_p6 }
 0x453   : > { %p1141_p12 = pnand %p1140_p10, %p1134_p13 }
 0x455   : > { %1144 = shalt.err (!%p1141_p12)
}
 0x456   : > { %1030 = dma.vmem_to_hbm [thread:$0]  (%p1557_p9), %s1497_s21, 256, %s1495_s16, %s894_s13  }
 0x457 PF: > { %p1042_p2 = scmp.ge.s32.totalorder %s1183_s12, 2  ;;  %s920_s17 = sand.u32 1, %s1171_s30  }
 0x458   : > { %p1558_p3 = scmp.ne.s32.totalorder %s1551_s20, 0  ;;  %s921_s22 = scalar_lea.sflag [#allocation4], %s920_s17 }
 0x45a   : > { %p1037_p4 = pnand %p1042_p2, %p1558_p3 }
 0x45c   : > { %1166 = dma.done.wait (!%p1037_p4), %s921_s22, 256  }
 0x45d   : > { %1168 = vsyncadd (!%p1037_p4), %s921_s22, 4294967040  ;;  %p20_p7 = scmp.ge.s32.totalorder %s1267_s15, 4   ;;  %s1559_s30 = smov %s1175_s10 }
 0x45e   : > { %s1560_s10 = smov %s1179_s11  ;;  %s1561_s11 = smov %s1278_s18 }
 0x45f   : > { %s1562_s12 = smov %s1267_s15  ;;  %22 = sbr.rel (!%p20_p7) target bundleno = 4 (0x4), region = 99 }
 0x466   :  { %926 = vsyncpa [#allocation3], 1 }
 0x467   :  { %928 = vsyncpa [#allocation3 + $0x1], 1 }
 0x468   :  { %929 = vsyncpa [#allocation4], 1 }
 0x469   :  { %931 = vsyncpa [#allocation4 + $0x1], 1 }

</bundles_post_ra>
